<compile_context>
chip_gen: v7x
topology: tpu7x:2x2x1
jax: 0.10.0
libtpu: 0.0.40
codegen_flags: <defaults>
</compile_context>

<pallas_src>
import functools

import jax
import jax.numpy as jnp
import numpy as np
from jax.experimental import pallas as pl
from jax.experimental.pallas import tpu as pltpu


# ---------------------------------------------------------------------------
# Kernel 1: weight quantization (run once, hoisted out of the conv grid).
# ---------------------------------------------------------------------------
def _quant_weight_kernel(w_ref, wn_ref, thr_ref, qw_ref, *, ternary):
    """Quantize the (O, K*K*Cpad) weights.

    Replicates the PyTorch reference where-chain exactly, including the quirk
    that the Wp branch is overwritten by the next line, so only Wn survives.
    """
    w = w_ref[...]                       # (O, K*K*Cpad) f32
    t = thr_ref[0]
    wn = wn_ref[0]

    # NOTE: like the reference, no epsilon guard on max_abs (an all-zero weight
    # tensor would produce NaN there as well).
    max_abs = jnp.max(jnp.abs(w))
    nw = w / max_abs
    if ternary:
        mask = jnp.where((nw > -t) & (nw <= t), 0.0, nw)
        mask = jnp.where(mask > t, 1.0, mask)
        mask = jnp.where(mask < -t, -1.0, mask)
    else:
        mask = jnp.where(nw > t, 1.0, nw)
        mask = jnp.where(mask < t, -1.0, mask)
    # reference: quantized_weight = where(mask == -1, Wn, mask)   (last write wins,
    # the Wp branch is discarded).  Values are {0, 1, Wn} -> exact in bf16.
    qw = jnp.where(mask == -1.0, wn, mask)
    qw_ref[...] = qw.astype(qw_ref.dtype)


# ---------------------------------------------------------------------------
# Kernel 2: the convolution, one padded image per grid step.
# ---------------------------------------------------------------------------
def _conv_kernel(x_ref, qw_ref, o_ref, *, K, Hp, Wpad, Ho, Wo, stride):
    """x_ref : (1, Cpad, Lext) f32 padded image flattened over (Hp, Wpad), plus a
               zero tail of (K-1)*Wpad + (K-1) lanes so every tap offset is a
               plain in-bounds lane slice.
       qw_ref: (O, K*K*Cpad) bf16 quantized weights (tap-major, channel-minor).
       o_ref : (1, O, Ho, Wo) f32 output block (NCHW, written directly).
    """
    L = Hp * Wpad
    x2d = x_ref[0]                       # (Cpad, Lext)
    C = x2d.shape[0]
    O = qw_ref.shape[0]

    # Stack the K*K shifted copies of the flat image so the whole convolution is
    # ONE MXU matmul of contraction depth K*K*Cpad (instead of K*K shallow-C
    # matmuls).  Each "shift" is just a lane slice of the flat image -- no
    # (pixels, C) patch relayouts.  Cpad is a multiple of 8, so the sublane
    # concatenation is tile-aligned.
    taps = []
    for kh in range(K):
        for kw in range(K):
            off = kh * Wpad + kw
            taps.append(jax.lax.slice(x2d, (0, off), (C, off + L)))
    stacked = jnp.concatenate(taps, axis=0).astype(jnp.bfloat16)   # (K*K*Cpad, L)

    # (O, K*K*Cpad) @ (K*K*Cpad, L) -> (O, L): pixels on lanes (lane-dense),
    # bf16 MXU feeds, f32 accumulation.
    acc = jnp.dot(qw_ref[...], stacked, preferred_element_type=jnp.float32)

    # Extract the valid (strided) output pixels and write NCHW directly.
    acc3 = acc.reshape(O, Hp, Wpad)
    out = jax.lax.slice(
        acc3, (0, 0, 0),
        (O, (Ho - 1) * stride + 1, (Wo - 1) * stride + 1),
        (1, stride, stride))                                        # (O, Ho, Wo)
    o_ref[0] = out.astype(o_ref.dtype)


# ---------------------------------------------------------------------------
# Wrapper: PyTorch-compatible interface (NCHW activations, OIHW weights).
# ---------------------------------------------------------------------------
def conv2d_quant_forward(x_nchw, weight_oihw, wp, wn, threshold,
                         *, ternary, stride, padding):
    """Forward pass of Conv2D_QuantModule.  `wp` is accepted for signature parity
    but (exactly like the reference where-chain) does not affect the forward."""
    del wp
    N, Cin, H, W = x_nchw.shape
    O, Ci, K, K2 = weight_oihw.shape
    assert Ci == Cin and K == K2

    Hp = H + 2 * padding
    Wpad = W + 2 * padding
    Ho = (Hp - K) // stride + 1
    Wo = (Wpad - K) // stride + 1
    L = Hp * Wpad
    Lext = L + (K - 1) * Wpad + (K - 1)       # zero tail: every tap slice stays in-bounds
    C_pad = ((Cin + 7) // 8) * 8              # full f32 sublane tile for aligned stacking

    # ---- 1) quantize the weights once (hoisted out of the conv grid) ----------
    # OIHW -> zero-pad input channels -> (O, K*K*Cpad), tap-major / channel-minor.
    # The padded channels have zero activations, so their quantized values are
    # irrelevant; padding with zeros also leaves the global max-abs unchanged.
    w_p = jnp.pad(weight_oihw.astype(jnp.float32),
                  ((0, 0), (0, C_pad - Cin), (0, 0), (0, 0)))
    w_flat = jnp.transpose(w_p, (0, 2, 3, 1)).reshape(O, K * K * C_pad)

    qw = pl.pallas_call(
        functools.partial(_quant_weight_kernel, ternary=ternary),
        out_shape=jax.ShapeDtypeStruct((O, K * K * C_pad), jnp.bfloat16),
        in_specs=[
            pl.BlockSpec(memory_space=pltpu.MemorySpace.VMEM),   # weights
            pl.BlockSpec(memory_space=pltpu.MemorySpace.SMEM),   # Wn
            pl.BlockSpec(memory_space=pltpu.MemorySpace.SMEM),   # threshold
        ],
        out_specs=pl.BlockSpec(memory_space=pltpu.MemorySpace.VMEM),
    )(w_flat, wn.astype(jnp.float32), threshold.astype(jnp.float32))

    # ---- 2) pad + flatten the activations (fused XLA glue; no transposes) -----
    # TODO(synk): for very large images, fold this zero-padding into in-kernel
    # halo handling and add an output-row-tile grid axis instead of one full
    # image per grid step.
    x_p = jnp.pad(x_nchw.astype(jnp.float32),
                  ((0, 0), (0, C_pad - Cin), (padding, padding), (padding, padding)))
    x_flat = jnp.pad(x_p.reshape(N, C_pad, L), ((0, 0), (0, 0), (0, Lext - L)))

    # ---- 3) convolution, gridded over the batch ("parallel" -> v7x megacore) --
    kernel = functools.partial(_conv_kernel, K=K, Hp=Hp, Wpad=Wpad,
                               Ho=Ho, Wo=Wo, stride=stride)
    out = pl.pallas_call(
        kernel,
        out_shape=jax.ShapeDtypeStruct((N, O, Ho, Wo), jnp.float32),
        grid=(N,),
        in_specs=[
            pl.BlockSpec((1, C_pad, Lext), lambda n: (n, 0, 0)),
            # constant block index -> the tiny quantized-weight block stays resident
            pl.BlockSpec((O, K * K * C_pad), lambda n: (0, 0)),
        ],
        out_specs=pl.BlockSpec((1, O, Ho, Wo), lambda n: (n, 0, 0, 0)),
        compiler_params=pltpu.CompilerParams(
            dimension_semantics=("parallel",),
            vmem_limit_bytes=48 * 1024 * 1024),
    )(x_flat, qw)
    return out                                  # already NCHW; no wrapper post-ops


# ---------------------------------------------------------------------------
# Plain-JAX references (verification only).
# ---------------------------------------------------------------------------
def _quantize_reference(weight, wn, threshold, ternary):
    t = threshold[0]
    max_abs = jnp.max(jnp.abs(weight))
    nw = weight / max_abs
    if ternary:
        mask = jnp.where((nw > -t) & (nw <= t), 0.0, nw)
        mask = jnp.where(mask > t, 1.0, mask)
        mask = jnp.where(mask < -t, -1.0, mask)
    else:
        mask = jnp.where(nw > t, 1.0, nw)
        mask = jnp.where(mask < t, -1.0, mask)
    return jnp.where(mask == -1.0, wn[0], mask)


def _reference_forward(x, weight, wn, threshold, *, ternary, stride, padding,
                       bf16_feeds=False):
    qw = _quantize_reference(weight.astype(jnp.float32), wn, threshold, ternary)
    lhs, rhs = x.astype(jnp.float32), qw
    if bf16_feeds:
        lhs, rhs = lhs.astype(jnp.bfloat16), rhs.astype(jnp.bfloat16)
    return jax.lax.conv_general_dilated(
        lhs, rhs, window_strides=(stride, stride),
        padding=[(padding, padding), (padding, padding)],
        dimension_numbers=("NCHW", "OIHW", "NCHW"),
        preferred_element_type=jnp.float32)


if __name__ == "__main__":
    # module config: Conv2D_QuantModule(ternary=True, in_channels=4, out_channels=8,
    #                                   kernel_size=3, stride=1, padding=1)
    ternary = True
    in_channels, out_channels, kernel_size = 4, 8, 3
    stride, padding = 1, 1
    threshold_val, Wp_init, Wn_init = 0.05, 1.0, -1.0

    key = jax.random.PRNGKey(0)
    kw_key, kx_key = jax.random.split(key)

    # nn.init.xavier_normal_ on (O, I, K, K): std = sqrt(2 / (fan_in + fan_out))
    fan_in = in_channels * kernel_size * kernel_size
    fan_out = out_channels * kernel_size * kernel_size
    xavier_std = float(np.sqrt(2.0 / (fan_in + fan_out)))
    weight = xavier_std * jax.random.normal(
        kw_key, (out_channels, in_channels, kernel_size, kernel_size), dtype=jnp.float32)

    Wp = jnp.array([Wp_init], dtype=jnp.float32)
    Wn = jnp.array([Wn_init], dtype=jnp.float32)
    thr = jnp.array([threshold_val], dtype=jnp.float32)

    x = jax.random.normal(kx_key, (2, in_channels, 16, 16), dtype=jnp.float32)

    fwd = jax.jit(functools.partial(conv2d_quant_forward,
                                    ternary=ternary, stride=stride, padding=padding))
    out = jax.block_until_ready(fwd(x, weight, Wp, Wn, thr))

    # (a) Exactness of the kernel logic: compare against a reference that uses the
    #     same bf16 MXU feeds (quantized weights are exactly {0, +1, Wn=-1}, so
    #     only the activation cast differs from full f32).
    ref_bf16 = _reference_forward(x, weight, Wn, thr, ternary=ternary,
                                  stride=stride, padding=padding, bf16_feeds=True)
    np.testing.assert_allclose(np.asarray(out), np.asarray(ref_bf16),
                               rtol=1e-3, atol=1e-3)

    # (b) Module-semantics check against the full-f32 reference, with a tolerance
    #     sized for the bf16 activation feed (|err| <~ K*K*C * 2^-9 * |x|).
    ref_f32 = _reference_forward(x, weight, Wn, thr, ternary=ternary,
                                 stride=stride, padding=padding, bf16_feeds=False)
    np.testing.assert_allclose(np.asarray(out), np.asarray(ref_f32),
                               rtol=5e-2, atol=5e-2)

    # TODO(synk): backward pass (custom Wp/Wn gradients) is not implemented; forward only.
    print("KERNEL_OK")
</pallas_src>

<mosaic_0001>
module attributes {stable_mosaic.version = 11 : i64} {
  func.func @_conv_kernel(%arg0: i32, %arg1: memref<1x8x362xf32, #tpu.memory_space<vmem>>, %arg2: memref<8x72xbf16, #tpu.memory_space<vmem>>, %arg3: memref<1x8x16x16xf32, #tpu.memory_space<vmem>>) attributes {dimension_semantics = [#tpu.dimension_semantics<parallel>], iteration_bounds = array<i64: 2>, scalar_prefetch = 0 : i64, scratch_operands = 0 : i64, tpu.core_type = #tpu.core_type<tc>, window_params = [{transform_indices = @transform_0, window_bounds = array<i64: 1, 8, 362>}, {pipeline_mode = #tpu.pipeline_mode<synchronous>, transform_indices = @transform_1, window_bounds = array<i64: 8, 72>}, {transform_indices = @transform_2, window_bounds = array<i64: 1, 8, 16, 16>}]} {
    %c0 = arith.constant 0 : index
    %c0_0 = arith.constant 0 : index
    %c0_1 = arith.constant 0 : index
    %0 = vector.load %arg1[%c0, %c0_0, %c0_1] : memref<1x8x362xf32, #tpu.memory_space<vmem>>, vector<1x8x362xf32>
    %1 = vector.shape_cast %0 : vector<1x8x362xf32> to vector<8x362xf32>
    %2 = vector.extract_strided_slice %1 {offsets = [0, 0], sizes = [8, 324], strides = [1, 1]} : vector<8x362xf32> to vector<8x324xf32>
    %3 = vector.extract_strided_slice %1 {offsets = [0, 1], sizes = [8, 324], strides = [1, 1]} : vector<8x362xf32> to vector<8x324xf32>
    %4 = vector.extract_strided_slice %1 {offsets = [0, 2], sizes = [8, 324], strides = [1, 1]} : vector<8x362xf32> to vector<8x324xf32>
    %5 = vector.extract_strided_slice %1 {offsets = [0, 18], sizes = [8, 324], strides = [1, 1]} : vector<8x362xf32> to vector<8x324xf32>
    %6 = vector.extract_strided_slice %1 {offsets = [0, 19], sizes = [8, 324], strides = [1, 1]} : vector<8x362xf32> to vector<8x324xf32>
    %7 = vector.extract_strided_slice %1 {offsets = [0, 20], sizes = [8, 324], strides = [1, 1]} : vector<8x362xf32> to vector<8x324xf32>
    %8 = vector.extract_strided_slice %1 {offsets = [0, 36], sizes = [8, 324], strides = [1, 1]} : vector<8x362xf32> to vector<8x324xf32>
    %9 = vector.extract_strided_slice %1 {offsets = [0, 37], sizes = [8, 324], strides = [1, 1]} : vector<8x362xf32> to vector<8x324xf32>
    %10 = vector.extract_strided_slice %1 {offsets = [0, 38], sizes = [8, 324], strides = [1, 1]} : vector<8x362xf32> to vector<8x324xf32>
    %11 = tpu.concatenate %2, %3, %4, %5, %6, %7, %8, %9, %10 in 0 : vector<8x324xf32>, vector<8x324xf32>, vector<8x324xf32>, vector<8x324xf32>, vector<8x324xf32>, vector<8x324xf32>, vector<8x324xf32>, vector<8x324xf32>, vector<8x324xf32> -> vector<72x324xf32>
    %12 = arith.truncf %11 : vector<72x324xf32> to vector<72x324xbf16>
    %c0_2 = arith.constant 0 : index
    %c0_3 = arith.constant 0 : index
    %13 = vector.load %arg2[%c0_2, %c0_3] : memref<8x72xbf16, #tpu.memory_space<vmem>>, vector<8x72xbf16>
    %cst = arith.constant dense<0.000000e+00> : vector<8x324xf32>
    %14 = tpu.matmul %13, %12, %cst {dimension_numbers = #tpu.dot_dimension_numbers<[1], [0], [0], [1], [0, 0, 1, 1], [], []>} : vector<8x72xbf16>, vector<72x324xbf16>, vector<8x324xf32> -> vector<8x324xf32>
    %15 = vector.shape_cast %14 : vector<8x324xf32> to vector<8x18x18xf32>
    %16 = vector.extract_strided_slice %15 {offsets = [0, 0, 0], sizes = [8, 16, 16], strides = [1, 1, 1]} : vector<8x18x18xf32> to vector<8x16x16xf32>
    %c0_4 = arith.constant 0 : index
    %c0_5 = arith.constant 0 : index
    %c0_6 = arith.constant 0 : index
    %c0_7 = arith.constant 0 : index
    %17 = vector.load %arg3[%c0_4, %c0_5, %c0_6, %c0_7] : memref<1x8x16x16xf32, #tpu.memory_space<vmem>>, vector<1x8x16x16xf32>
    %18 = vector.shape_cast %17 : vector<1x8x16x16xf32> to vector<8x16x16xf32>
    %19 = vector.shape_cast %16 : vector<8x16x16xf32> to vector<1x8x16x16xf32>
    tpu.vector_store %arg3[%c0_4, %c0_5, %c0_6, %c0_7], %19 {strides = array<i32>} : memref<1x8x16x16xf32, #tpu.memory_space<vmem>>, vector<1x8x16x16xf32>,
    return
  }
  func.func @transform_0(%arg0: i32) -> (i32, i32, i32) {
    %c0_i32 = arith.constant 0 : i32
    %c0_i32_0 = arith.constant 0 : i32
    %c0_i32_1 = arith.constant 0 : i32
    return %arg0, %c0_i32, %c0_i32_0 : i32, i32, i32
  }
  func.func @transform_1(%arg0: i32) -> (i32, i32) {
    %c0_i32 = arith.constant 0 : i32
    %c0_i32_0 = arith.constant 0 : i32
    %c0_i32_1 = arith.constant 0 : i32
    return %c0_i32, %c0_i32_0 : i32, i32
  }
  func.func @transform_2(%arg0: i32) -> (i32, i32, i32, i32) {
    %c0_i32 = arith.constant 0 : i32
    %c0_i32_0 = arith.constant 0 : i32
    %c0_i32_1 = arith.constant 0 : i32
    %c0_i32_2 = arith.constant 0 : i32
    return %arg0, %c0_i32, %c0_i32_0, %c0_i32_1 : i32, i32, i32, i32
  }
}

module attributes {stable_mosaic.version = 11 : i64} {
  func.func @_quant_weight_kernel(%arg0: memref<8x72xf32, #tpu.memory_space<vmem>>, %arg1: memref<1xf32, #tpu.memory_space<smem>>, %arg2: memref<1xf32, #tpu.memory_space<smem>>, %arg3: memref<8x72xbf16, #tpu.memory_space<vmem>>) attributes {dimension_semantics = [], scalar_prefetch = 0 : i64, scratch_operands = 0 : i64, tpu.core_type = #tpu.core_type<tc>} {
    %c0 = arith.constant 0 : index
    %c0_0 = arith.constant 0 : index
    %0 = vector.load %arg0[%c0, %c0_0] : memref<8x72xf32, #tpu.memory_space<vmem>>, vector<8x72xf32>
    %c0_1 = arith.constant 0 : index
    %1 = memref.load %arg2[%c0_1] : memref<1xf32, #tpu.memory_space<smem>>
    %c0_2 = arith.constant 0 : index
    %2 = memref.load %arg1[%c0_2] : memref<1xf32, #tpu.memory_space<smem>>
    %3 = math.absf %0 : vector<8x72xf32>
    %4 = vector.shape_cast %3 : vector<8x72xf32> to vector<1x8x72xf32>
    %cst = arith.constant dense<0xFF800000> : vector<1xf32>
    %5 = vector.multi_reduction <maximumf>, %4, %cst [1, 2] : vector<1x8x72xf32> to vector<1xf32>
    %6 = vector.shape_cast %5 : vector<1xf32> to vector<1x1x1xf32>
    %7 = vector.extract %6[0, 0, 0] : f32 from vector<1x1x1xf32>
    %8 = vector.broadcast %7 : f32 to vector<8x72xf32>
    %9 = arith.divf %0, %8 : vector<8x72xf32>
    %cst_3 = arith.constant 0.000000e+00 : f32
    %10 = arith.subf %cst_3, %1 : f32
    %11 = vector.broadcast %10 : f32 to vector<8x72xf32>
    %12 = arith.cmpf ogt, %9, %11 : vector<8x72xf32>
    %13 = vector.broadcast %1 : f32 to vector<8x72xf32>
    %14 = arith.cmpf ole, %9, %13 : vector<8x72xf32>
    %15 = arith.andi %12, %14 : vector<8x72xi1>
    %cst_4 = arith.constant 0.000000e+00 : f32
    %16 = vector.broadcast %cst_4 : f32 to vector<8x72xf32>
    %17 = arith.select %15, %16, %9 : vector<8x72xi1>, vector<8x72xf32>
    %18 = vector.broadcast %1 : f32 to vector<8x72xf32>
    %19 = arith.cmpf ogt, %17, %18 : vector<8x72xf32>
    %cst_5 = arith.constant 1.000000e+00 : f32
    %20 = vector.broadcast %cst_5 : f32 to vector<8x72xf32>
    %21 = arith.select %19, %20, %17 : vector<8x72xi1>, vector<8x72xf32>
    %cst_6 = arith.constant 0.000000e+00 : f32
    %22 = arith.subf %cst_6, %1 : f32
    %23 = vector.broadcast %22 : f32 to vector<8x72xf32>
    %24 = arith.cmpf olt, %21, %23 : vector<8x72xf32>
    %cst_7 = arith.constant -1.000000e+00 : f32
    %25 = vector.broadcast %cst_7 : f32 to vector<8x72xf32>
    %26 = arith.select %24, %25, %21 : vector<8x72xi1>, vector<8x72xf32>
    %cst_8 = arith.constant -1.000000e+00 : f32
    %27 = vector.broadcast %cst_8 : f32 to vector<8x72xf32>
    %28 = arith.cmpf oeq, %26, %27 : vector<8x72xf32>
    %29 = vector.broadcast %2 : f32 to vector<8x72xf32>
    %30 = arith.select %28, %29, %26 : vector<8x72xi1>, vector<8x72xf32>
    %31 = arith.truncf %30 : vector<8x72xf32> to vector<8x72xbf16>
    %c0_9 = arith.constant 0 : index
    %c0_10 = arith.constant 0 : index
    %32 = vector.load %arg3[%c0_9, %c0_10] : memref<8x72xbf16, #tpu.memory_space<vmem>>, vector<8x72xbf16>
    tpu.vector_store %arg3[%c0_9, %c0_10], %31 {strides = array<i32>} : memref<8x72xbf16, #tpu.memory_space<vmem>>, vector<8x72xbf16>,
    return
  }
}

</mosaic_0001>

<bundles_post_ra>
// kernel: conv2d_quant_forward.2
= control target key start
LH: loop header
LB: loop body
LE: loop exit
PB: predicated region body
PF: predicated region fallthrough
CT: control target
= control target key end

     0   :  { %vm20_vm0 = vcmask 588800   ;;  %vm49_vm7 = vcmask 584704   ;;  %s94_s0 = inlined_call_operand.vmem [shape: f32[8,72], index: 0, kind: input, shape index: {}]   ;;  %s95_s2 = inlined_call_operand.<no memory space> [shape: f32[1], index: 2, kind: input, shape index: {}]   ;;  %s96_s1 = inlined_call_operand.<no memory space> [shape: f32[1], index: 1, kind: input, shape index: {}]   ;;  %s97_s3 = inlined_call_operand.vmem [shape: bf16[8,72], index: 3, kind: output, shape index: {}]  }
   0x1   :  { %v16_v0 = vld [vmem:[%s94_s0] sm:$0xff]  ;;  %s34_s17 = ssub.f32 0.0, %s95_s2  ;;  %v37_v13 = vstv %s95_s2  ;;  %v46_v17 = vstv %s96_s1 }
   0x2   :  { %v19_v1 = vand.u32 2147483647, %v16_v0 }
   0x3   :  { %v35_v12 = vstv %s34_s17 }
   0x4   :  { %v21_v2 = vsel %vm20_vm0, %v19_v1, -inf }
   0x5   :  { %22 = vmax.xlane.f32.xlu0 %v21_v2 }
  0x92   :  { %v23_v3 = vpop.xlane.xlu0 %22 }
  0x93   :  { %v24_v4 = vrot.slane %v23_v3, 4 }
  0x95   :  { %v25_v5 = vmax.f32 %v23_v3, %v24_v4 }
  0x97   :  { %v26_v6 = vrot.slane %v25_v5, 2 }
  0x99   :  { %v27_v7 = vmax.f32 %v25_v5, %v26_v6 }
  0x9b   :  { %v28_v8 = vrot.slane %v27_v7, 1 }
  0x9d   :  { %v29_v9 = vmax.f32 %v27_v7, %v28_v8 }
  0x9f   :  { %55 = vpush %v29_v9 }
  0xd0   :  { %s56_s14 = spop %55 }
  0xd1   :  { %v31_v10 = vstv %s56_s14 }
  0xd2   :  { %57 = vrcp.f32 %v31_v10 }
  0xdc   :  { %v58_v11 = vpop.eup %57 }
  0xdd   :  { %v33_v14 = vmul.f32 %v58_v11, %v16_v0 }
  0xdf   :  { %vm36_vm1 = vcmp.gt.f32.partialorder %v33_v14, %v35_v12  ;;  %vm38_vm2 = vcmp.le.f32.partialorder %v33_v14, %v37_v13 }
  0xe0   :  { %vm39_vm3 = vmand %vm36_vm1, %vm38_vm2 }
  0xe1   :  { %v40_v15 = vsel %vm39_vm3, 0.0, %v33_v14 }
  0xe2   :  { %vm41_vm4 = vcmp.gt.f32.partialorder %v40_v15, %v37_v13 }
  0xe3   :  { %v42_v16 = vsel %vm41_vm4, 1.0, %v40_v15 }
  0xe4   :  { %vm43_vm5 = vcmp.lt.f32.partialorder %v42_v16, %v35_v12 }
  0xe5   :  { %v44_v18 = vsel %vm43_vm5, -1.0, %v42_v16 }
  0xe6   :  { %vm45_vm6 = vcmp.eq.f32.partialorder %v44_v18, -1.0 }
  0xe7   :  { %v47_v19 = vsel %vm45_vm6, %v46_v17, %v44_v18 }
  0xe8   :  { %v48_v20 = vpack.c.bf16 %v47_v19, %v47_v19 }
  0xea   :  { %50 = vst.msk [vmem:[%s97_s3] sm:$0xf] %vm49_vm7, %v48_v20 }

// kernel: conv2d_quant_forward.3
= control target key start
LH: loop header
LB: loop body
LE: loop exit
PB: predicated region body
PF: predicated region fallthrough
CT: control target
= control target key end

     0   :  { %7 = vsyncpa [#allocation3], 0  ;;  %s1239_s0 = inlined_call_operand.vmem [shape: f32[2,8,362], index: 0, kind: input, shape index: {}]   ;;  %s1240_s1 = inlined_call_operand.vmem [shape: bf16[8,72], index: 1, kind: input, shape index: {}]   ;;  %s1241_s2 = inlined_call_operand.hbm [shape: f32[2,8,16,16], index: 2, kind: output, shape index: {}]  }
   0x1   :  { %9 = vsyncpa [#allocation3 + $0x1], 0  ;;  %s1028_s9 = smov 0   ;;  %s1030_s10 = smov 0  }
   0x2   :  { %s1032_s11 = smov 0   ;;  %s1034_s12 = smov 0  }
   0x3 LB: > { %s1049_s13 = sadd.s32 4294967295, %s982_s12   ;;  %s777_s14 = sadd.s32 4294967294, %s982_s12   ;;  %s982_s12 = sphi %s1034_s12, %s1247_s12   ;;  %s978_s11 = sphi %s1032_s11, %s1246_s11   ;;  %s974_s10 = sphi %s1030_s10, %s1245_s10   ;;  %s970_s9 = sphi %s1028_s9, %s1244_s9  }
   0x4   : > { %s1053_s15 = sadd.s32 1, %s982_s12   ;;  %s69_s16 = sadd.s32 1, %s978_s11 }
   0x5   : > { %s66_s17 = ssub.s32 %s982_s12, %s1053_s15  ;;  %p79_p0 = scmp.ne.s32.totalorder %s978_s11, %s974_s10 }
   0x6   : > { %p67_p1 = scmp.eq.s32.totalorder %s66_s17, 0  ;;  %p80_p2 = scmp.eq.s32.totalorder %s1049_s13, 1 }
   0x7   : > { %p85_p3 = scmp.ne.s32.totalorder %s974_s10, %s970_s9  ;;  %p86_p4 = scmp.eq.s32.totalorder %s777_s14, 1 }
   0x8   : > { %s1064_s18 = scalar_select %p67_p1, %s978_s11, %s69_s16  }
   0x9   : > { %p1066_p5 = por %p80_p2, %p79_p0  ;;  %p1070_p6 = por %p86_p4, %p85_p3 }
   0xa   : > { %p780_p7 = scmp.ge.s32.totalorder %s982_s12, 1  ;;  %p115_p8 = scmp.lt.s32.totalorder %s982_s12, 3 }
   0xc   : > { %p116_p9 = pnand %p780_p7, %p115_p8 }
   0xd   : > { %p137_p10 = scmp.lt.s32.totalorder (!%p116_p9), %s1049_s13, 1  ;;  %v984_v0 = vmov (!%p116_p9), 0.0   ;;  %s985_s26 = smov (!%p116_p9), 126   ;;  %vm992_vm0 = vmmov (!%p116_p9), 0   ;;  %v993_v5 = vmov (!%p116_p9), 0   ;;  %vm155_vm1 = vcmask (!%p116_p9), 1039360  }
   0xe   : > { %119 = sbr.rel (%p116_p9) target bundleno = 568 (0x238), region = 28  ;;  %798 = vmatprep.subr.bf16.mxu1 (!%p116_p9), %v984_v0  ;;  %s986_s27 = smov (!%p116_p9), 127   ;;  %808 = vmatprep.mubr.msk.bf16.mxu1 (!%p116_p9), %vm992_vm0, %v984_v0  ;;  %vm179_vm2 = vcmask (!%p116_p9), 900096   ;;  %vm167_vm3 = vcmask (!%p116_p9), 1031168   ;;  %vm203_vm4 = vcmask (!%p116_p9), 883712   ;;  %vm191_vm5 = vcmask (!%p116_p9), 891904  }
   0xf   : > { %s987_s28 = smov (!%p116_p9), 110   ;;  %s988_s29 = smov (!%p116_p9), 108   ;;  %307 = vmatprep.mubr.bf16.mxu0 (!%p116_p9), %v993_v5  ;;  %vm227_vm6 = vcmask (!%p116_p9), 744448   ;;  %vm215_vm7 = vcmask (!%p116_p9), 752640   ;;  %vm239_vm8 = vcmask (!%p116_p9), 736256   ;;  %vm265_vm9 = vcmask (!%p116_p9), 1043456  }
  0x10   : > { %s989_s30 = smov (!%p116_p9), 109   ;;  %s990_s3 = smov (!%p116_p9), 91   ;;  %vm261_vm10 = vcmask (!%p116_p9), 588800   ;;  %vm380_vm11 = vcmask (!%p116_p9), 15360   ;;  %vm684_vm12 = vcmask (!%p116_p9), 130048   ;;  %vm406_vm13 = vcmask (!%p116_p9), 31744  }
  0x11   : > { %s991_s4 = smov (!%p116_p9), 92   ;;  %s994_s5 = smov (!%p116_p9), 90  }
  0x12   : > { %s995_s8 = smov (!%p116_p9), 4   ;;  %s996_s14 = smov (!%p116_p9), 2  }
  0x13   : > { %s997_s16 = smov (!%p116_p9), 56   ;;  %s998_s17 = smov (!%p116_p9), 74  }
  0x14   : > { %s1001_s23 = smov (!%p116_p9), 94   ;;  %s1002_s24 = smov (!%p116_p9), 112  }
  0x15   : > { %s138_s21 = scalar_select %p137_p10, %s1049_s13, 1 }
  0x17   : > { %s812_s22 = smul.u32 24, %s138_s21  ;;  %s999_s21 = smov 20  }
  0x19   : > { %s141_s25 = scalar_lea.vmem %s1239_s0, %s812_s22  ;;  %s1000_s22 = smov 38  }
  0x1a   : > { %v144_v1 = vld [vmem:[%s141_s25 + $0x8] sm:$0xff]  ;;  %v145_v2 = vld [vmem:[%s141_s25 + $0x10] sm:$0xff]  ;;  %v143_v4 = vld [vmem:[%s141_s25] sm:$0xff]  ;;  %s1003_s25 = smov 58  }
  0x1b   : > { %v885_v3 = vpack.i.bf16 %v145_v2, %v144_v1  ;;  %v915_v6 = vpack.i.bf16 %v144_v1, %v143_v4 }
  0x1d   : > { %886 = vrot.lane.b32.xlu1 %v885_v3, %s985_s26  ;;  %881 = vrot.lane.b32.xlu0 %v885_v3, %s986_s27 }
  0x21   : > { %891 = vrot.lane.b32.xlu1 %v885_v3, %s987_s28  ;;  %149 = vrot.lane.b32.xlu0 %v143_v4, %s986_s27  ;;  %s1005_s27 = smov 22  }
  0x25   : > { %173 = vrot.lane.b32.xlu1 %v143_v4, %s987_s28  ;;  %161 = vrot.lane.b32.xlu0 %v143_v4, %s985_s26  ;;  %s1004_s26 = smov 76  }
  0x29   : > { %901 = vrot.lane.b32.xlu1 %v885_v3, %s988_s29  ;;  %896 = vrot.lane.b32.xlu0 %v885_v3, %s989_s30 }
  0x2d   : > { %197 = vrot.lane.b32.xlu1 %v143_v4, %s988_s29  ;;  %185 = vrot.lane.b32.xlu0 %v143_v4, %s989_s30  ;;  %s1007_s29 = smov 114   ;;  %s134_s30 = sand.u32 1, %s974_s10  }
  0x31   : > { %911 = vrot.lane.b32.xlu1 %v885_v3, %s990_s3  ;;  %906 = vrot.lane.b32.xlu0 %v885_v3, %s991_s4 }
  0x35   : > { %221 = vrot.lane.b32.xlu1 %v143_v4, %s990_s3  ;;  %209 = vrot.lane.b32.xlu0 %v143_v4, %s991_s4  ;;  %s781_s3 = sshll.u32 %s134_s30, 7 }
  0x39   : > { %237 = vrot.lane.b32.xlu1 %v145_v2, %s994_s5  ;;  %916 = vrot.lane.b32.xlu0 %v915_v6, %s994_s5  ;;  %s791_s5 = sshll.u32 %s1049_s13, 11 }
  0x8f   : > { %v887_v7 = vpop.permute.xlu1 %886  ;;  %v882_v8 = vpop.permute.xlu0 %881 }
  0x90   : > { %v884_v9 = vunpack.i.h.bf16 %v882_v8  ;;  %v883_v10 = vunpack.i.l.bf16 %v882_v8  ;;  %v889_v11 = vunpack.i.h.bf16 %v887_v7  ;;  %v888_v12 = vunpack.i.l.bf16 %v887_v7  ;;  %v260_v8 = vld [vmem:[%s1240_s1] sm:$0xf] }
  0x92   : > { %v247_v13 = vpack.c.bf16 %v884_v9, %v145_v2  ;;  %v157_v14 = vsel %vm155_vm1, %v883_v10, %v884_v9  ;;  %v169_v23 = vsel %vm167_vm3, %v888_v12, %v889_v11 }
  0x93   : > { %v892_v15 = vpop.permute.xlu1 %891  ;;  %v150_v16 = vpop.permute.xlu0 %149  ;;  %v246_v17 = vpack.c.bf16 %v157_v14, %v144_v1 }
  0x94   : > { %v894_v18 = vunpack.i.h.bf16 %v892_v15  ;;  %v893_v19 = vunpack.i.l.bf16 %v892_v15  ;;  %v156_v20 = vsel %vm155_vm1, %v150_v16, %v883_v10  ;;  %799 = vmatpush3.bf16.msra.mxu1 %v247_v13 }
  0x95   : > { %275 = vmatprep.subr.bf16.mxu0 %v246_v17  ;;  %800 = vmatprep.subr.bf16.mxu1 %v984_v0  ;;  %v245_v21 = vpack.c.bf16 %v156_v20, %v143_v4  ;;  %v1008_v20 = vmov 1983009808  }
  0x96   : > { %v250_v22 = vpack.c.bf16 %v894_v18, %v889_v11  ;;  %v181_v24 = vsel %vm179_vm2, %v893_v19, %v894_v18 }
  0x97   : > { %v174_v25 = vpop.permute.xlu1 %173  ;;  %276 = vmatpush1.bf16.msra.mxu0 %v245_v21  ;;  %v162_v26 = vpop.permute.xlu0 %161  ;;  %v249_v27 = vpack.c.bf16 %v181_v24, %v169_v23  ;;  %v415_v21 = vunpack.c.l.s4 %v1008_v20 }
  0x98   : > { %v180_v28 = vsel %vm179_vm2, %v174_v25, %v893_v19  ;;  %v168_v29 = vsel %vm167_vm3, %v162_v26, %v888_v12  ;;  %801 = vmatpush3.bf16.msra.mxu1 %v250_v22  ;;  %v417_v22 = vlaneseq }
  0x99   : > { %v248_v30 = vpack.c.bf16 %v180_v28, %v168_v29  ;;  %277 = vmatprep.subr.bf16.mxu0 %v249_v27  ;;  %802 = vmatprep.subr.bf16.mxu1 %v984_v0  ;;  %v416_v25 = vunpack.c.0.s8 %v415_v21  ;;  %v1009_v28 = vmov 1934713408  }
  0x9a   : > { %v418_v26 = vshrl.u32 %v417_v22, 7  ;;  %v479_v29 = vunpack.c.l.s4 %v1009_v28 }
  0x9b   : > { %v902_v31 = vpop.permute.xlu1 %901  ;;  %278 = vmatpush1.bf16.msra.mxu0 %v248_v30  ;;  %v897_v32 = vpop.permute.xlu0 %896 }
  0x9c   : > { %v904_v33 = vunpack.i.h.bf16 %v902_v31  ;;  %v903_v34 = vunpack.i.l.bf16 %v902_v31  ;;  %v899_v35 = vunpack.i.h.bf16 %v897_v32  ;;  %v898_v36 = vunpack.i.l.bf16 %v897_v32 }
  0x9d   : > { %v1111_v32 = vsub.s32 %v416_v25, %v418_v26 }
  0x9e   : > { %v253_v37 = vpack.c.bf16 %v904_v33, %v899_v35  ;;  %v193_v38 = vsel %vm191_vm5, %v898_v36, %v899_v35  ;;  %v205_v39 = vsel %vm203_vm4, %v903_v34, %v904_v33 }
  0x9f   : > { %v198_v40 = vpop.permute.xlu1 %197  ;;  %v186_v41 = vpop.permute.xlu0 %185  ;;  %v252_v42 = vpack.c.bf16 %v205_v39, %v193_v38 }
  0xa0   : > { %v204_v43 = vsel %vm203_vm4, %v198_v40, %v903_v34  ;;  %v192_v44 = vsel %vm191_vm5, %v186_v41, %v898_v36  ;;  %803 = vmatpush3.bf16.msra.mxu1 %v253_v37  ;;  %v480_v37 = vunpack.c.0.s8 %v479_v29 }
  0xa1   : > { %v251_v45 = vpack.c.bf16 %v204_v43, %v192_v44  ;;  %279 = vmatprep.subr.bf16.mxu0 %v252_v42  ;;  %804 = vmatprep.subr.bf16.mxu1 %v984_v0 }
  0xa3   : > { %v912_v46 = vpop.permute.xlu1 %911  ;;  %v907_v47 = vpop.permute.xlu0 %906  ;;  %280 = vmatpush1.bf16.msra.mxu0 %v251_v45 }
  0xa4   : > { %v914_v48 = vunpack.i.h.bf16 %v912_v46  ;;  %v913_v49 = vunpack.i.l.bf16 %v912_v46  ;;  %v909_v50 = vunpack.i.h.bf16 %v907_v47  ;;  %v908_v51 = vunpack.i.l.bf16 %v907_v47 }
  0xa6   : > { %v256_v52 = vpack.c.bf16 %v914_v48, %v909_v50  ;;  %v217_v53 = vsel %vm215_vm7, %v908_v51, %v909_v50  ;;  %v229_v54 = vsel %vm227_vm6, %v913_v49, %v914_v48 }
  0xa7   : > { %v222_v55 = vpop.permute.xlu1 %221  ;;  %v210_v56 = vpop.permute.xlu0 %209  ;;  %v255_v57 = vpack.c.bf16 %v229_v54, %v217_v53 }
  0xa8   : > { %v228_v58 = vsel %vm227_vm6, %v222_v55, %v913_v49  ;;  %v216_v59 = vsel %vm215_vm7, %v210_v56, %v908_v51  ;;  %805 = vmatpush3.bf16.msra.mxu1 %v256_v52  ;;  %v1119_v49 = vsub.s32 %v480_v37, %v418_v26 }
  0xa9   : > { %v254_v60 = vpack.c.bf16 %v228_v58, %v216_v59  ;;  %281 = vmatprep.subr.bf16.mxu0 %v255_v57  ;;  %806 = vmatprep.subr.bf16.mxu1 %v984_v0 }
  0xab   : > { %v238_v61 = vpop.permute.xlu1 %237  ;;  %v917_v62 = vpop.permute.xlu0 %916  ;;  %282 = vmatpush1.bf16.msra.mxu0 %v254_v60 }
  0xac   : > { %v259_v63 = vpack.c.bf16 %v238_v61, %v238_v61  ;;  %v919_v1 = vunpack.i.h.bf16 %v917_v62  ;;  %v918_v2 = vunpack.i.l.bf16 %v917_v62 }
  0xae   : > { %v241_v3 = vsel %vm239_vm8, %v919_v1, %v238_v61  ;;  %v273_v4 = vsel %vm265_vm9, %v259_v63, 0  ;;  %v240_v5 = vsel %vm239_vm8, %v918_v2, %v919_v1 }
  0xaf   : > { %v258_v6 = vpack.c.bf16 %v241_v3, %v241_v3  ;;  %807 = vmatpush3.bf16.msra.mxu1 %v273_v4  ;;  %v257_v7 = vpack.c.bf16 %v240_v5, %v240_v5 }
  0xb1   : > { %783 = vmatprep.subr.msk.bf16.mxu0 %vm265_vm9, %v258_v6  ;;  %v267_v0 = vsel %vm265_vm9, %v257_v7, 0 }
  0xb2   : > { %284 = vmatpush1.bf16.msra.mxu0 %v267_v0  ;;  %809 = vmatmul.mubr.msk.bf16.vlgmr.msra.gmra.mrb[0].mxu1 %vm261_vm10, %v260_v8 }
  0xb5   : > { %784 = vmatmul.mubr.msk.bf16.vlgmr.msra.gmra.mrb[0].mxu0 %vm261_vm10, %v260_v8 }
 0x185   : > { %v350_v9 = vpop.f32.mrb[0].mxu1 }
 0x186   : > { %404 = vrot.lane.b32.xlu1 %v350_v9, %s995_s8  ;;  %v810_v10 = vpop.f32.mrb[1].mxu1 }
 0x187   : > { %v353_v11 = vpop.f32.mrb[2].mxu1 }
 0x188   : > { %v1098_v12 = vpop.f32.mrb[0].mxu0  ;;  %v811_v13 = vpop.f32.mrb[3].mxu1 }
 0x189   : > { %376 = vrot.lane.b32.xlu0 %v1098_v12, %s996_s14  ;;  %v311_v14 = vpop.f32.mrb[1].mxu0 }
 0x18a   : > { %360 = vrot.lane.b32.xlu1 %v1098_v12, %s991_s4  ;;  %v313_v15 = vpop.f32.mrb[2].mxu0  ;;  %s1136_s4 = scalar_lea.vmem [#allocation2], %s781_s3 }
 0x18b   : > { %v314_v16 = vpop.f32.mrb[3].mxu0  ;;  %s715_s6 = sshll.u32 %s1136_s4, 4  ;;  %s1178_s6 = int_to_ptr.vmem [resolvable:$true] %s715_s6 }
 0x18d   : > { %357 = vrot.lane.b32.xlu0 %v1098_v12, %s987_s28  ;;  %s1006_s28 = smov 40  }
 0x18e   : > { %366 = vrot.lane.b32.xlu1 %v1098_v12, %s997_s16  ;;  %s920_s16 = scalar_lea.vmem %s1178_s6, 2048 }
 0x18f   : > { %p921_p11 = scmp.ne.s32.totalorder %s1178_s6, %s920_s16 }
 0x191   : > { %363 = vrot.lane.b32.xlu0 %v1098_v12, %s998_s17  ;;  %p922_p12 = pnand %p921_p11, %p1066_p5  ;;  %s1010_s17 = smov [#allocation2]  }
 0x192   : > { %372 = vrot.lane.b32.xlu1 %v1098_v12, %s999_s21  ;;  %s924_s21 = sshll.u32 %s1010_s17, 4  ;;  %s925_s21 = int_to_ptr.vmem [resolvable:$false] %s924_s21 }
 0x193   : > { %p923_p13 = pneg %p922_p12  ;;  %p927_p0 = scmp.lt.s32.totalorder %s1178_s6, %s925_s21 }
 0x195   : > { %369 = vrot.lane.b32.xlu0 %v1098_v12, %s1000_s22  ;;  %s926_s22 = scalar_lea.vmem %s925_s21, 4096 }
 0x196   : > { %378 = vrot.lane.b32.xlu1 %v311_v14, %s996_s14  ;;  %s1198_s14 = scalar_lea.sflag [#allocation3], %s134_s30  ;;  %p928_p1 = scmp.lt.s32.totalorder %s926_s22, %s920_s16 }
 0x198   : > { %p929_p2 = por %p928_p1, %p927_p0 }
 0x199   : > { %402 = vrot.lane.b32.xlu0 %v311_v14, %s995_s8  ;;  %s1176_s8 = scalar_lea.hbm %s1241_s2, %s791_s5 }
 0x19a   : > { %386 = vrot.lane.b32.xlu1 %v311_v14, %s1001_s23  ;;  %p930_p3 = pnand %p929_p2, %p923_p13 }
 0x19d   : > { %383 = vrot.lane.b32.xlu0 %v311_v14, %s1002_s24 }
 0x19e   : > { %392 = vrot.lane.b32.xlu1 %v311_v14, %s1003_s25 }
 0x1a1   : > { %389 = vrot.lane.b32.xlu0 %v311_v14, %s1004_s26 }
 0x1a2   : > { %398 = vrot.lane.b32.xlu1 %v311_v14, %s1005_s27 }
 0x1a5   : > { %395 = vrot.lane.b32.xlu0 %v311_v14, %s1006_s28 }
 0x1a9   : > { %409 = vrot.lane.b32.xlu0 %v350_v9, %s1007_s29 }
 0x1f8   : > { %v1109_v17 = vpop.permute.xlu1 %404 }
 0x1fb   : > { %v377_v18 = vpop.permute.xlu0 %376 }
 0x1fc   : > { %v361_v19 = vpop.permute.xlu1 %360 }
 0x1fd   : > { %v412_v33 = vcombine.low %v1098_v12, %v361_v19  ;;  %v413_v36 = vcombine.high %v1098_v12, %v361_v19 }
 0x1ff   : > { %v358_v23 = vpop.permute.xlu0 %357  ;;  %v420_v43 = vrot.slane %v412_v33, %v1111_v32  ;;  %v427_v48 = vrot.slane %v413_v36, %v1111_v32 }
 0x200   : > { %v367_v24 = vpop.permute.xlu1 %366 }
 0x203   : > { %v364_v27 = vpop.permute.xlu0 %363 }
 0x204   : > { %v428_v30 = vcombine.low %v358_v23, %v364_v27  ;;  %v373_v31 = vpop.permute.xlu1 %372  ;;  %v429_v34 = vcombine.high %v358_v23, %v364_v27 }
 0x205   : > { %v444_v40 = vcombine.low %v367_v24, %v373_v31  ;;  %v445_v41 = vcombine.high %v367_v24, %v373_v31 }
 0x206   : > { %v436_v38 = vrot.slane %v428_v30, %v1111_v32  ;;  %v443_v44 = vrot.slane %v429_v34, %v1111_v32 }
 0x207   : > { %v370_v35 = vpop.permute.xlu0 %369  ;;  %v452_v52 = vrot.slane %v444_v40, %v1111_v32  ;;  %v459_v53 = vrot.slane %v445_v41, %v1111_v32 }
 0x208   : > { %v379_v39 = vpop.permute.xlu1 %378  ;;  %v476_v50 = vcombine.low %v420_v43, %v436_v38  ;;  %v477_v51 = vcombine.high %v420_v43, %v436_v38  ;;  %v492_v56 = vcombine.low %v427_v48, %v443_v44  ;;  %v493_v57 = vcombine.high %v427_v48, %v443_v44 }
 0x209   : > { %v381_v42 = vsel %vm380_vm11, %v377_v18, %v379_v39 }
 0x20a   : > { %v460_v45 = vcombine.low %v370_v35, %v381_v42  ;;  %v461_v46 = vcombine.high %v370_v35, %v381_v42  ;;  %v484_v1 = vrot.slane %v476_v50, %v1119_v49  ;;  %v491_v2 = vrot.slane %v477_v51, %v1119_v49 }
 0x20b   : > { %v403_v47 = vpop.permute.xlu0 %402  ;;  %v500_v7 = vrot.slane %v492_v56, %v1119_v49  ;;  %v507_v8 = vrot.slane %v493_v57, %v1119_v49 }
 0x20c   : > { %v468_v54 = vrot.slane %v460_v45, %v1111_v32  ;;  %v475_v55 = vrot.slane %v461_v46, %v1111_v32  ;;  %v387_v58 = vpop.permute.xlu1 %386  ;;  %v407_v23 = vsel %vm406_vm13, %v403_v47, %v1109_v17 }
 0x20e   : > { %v508_v59 = vcombine.low %v452_v52, %v468_v54  ;;  %v509_v60 = vcombine.high %v452_v52, %v468_v54  ;;  %v524_v61 = vcombine.low %v459_v53, %v475_v55  ;;  %v525_v62 = vcombine.high %v459_v53, %v475_v55 }
 0x20f   : > { %v384_v63 = vpop.permute.xlu0 %383 }
 0x210   : > { %v516_v3 = vrot.slane %v508_v59, %v1119_v49  ;;  %v523_v4 = vrot.slane %v509_v60, %v1119_v49  ;;  %v532_v5 = vrot.slane %v524_v61, %v1119_v49  ;;  %v539_v6 = vrot.slane %v525_v62, %v1119_v49  ;;  %v393_v18 = vpop.permute.xlu1 %392 }
 0x211   : > { %v564_v20 = vcombine.low %v387_v58, %v393_v18  ;;  %v565_v24 = vcombine.high %v387_v58, %v393_v18 }
 0x212   : > { %v540_v0 = vcombine.low %v484_v1, %v516_v3  ;;  %v541_v9 = vcombine.high %v484_v1, %v516_v3  ;;  %v542_v10 = vcombine.low %v491_v2, %v523_v4  ;;  %v543_v11 = vcombine.high %v491_v2, %v523_v4 }
 0x213   : > { %v390_v12 = vpop.permute.xlu0 %389  ;;  %v544_v13 = vcombine.low %v500_v7, %v532_v5  ;;  %v545_v14 = vcombine.high %v500_v7, %v532_v5  ;;  %v546_v15 = vcombine.low %v507_v8, %v539_v6  ;;  %v547_v16 = vcombine.high %v507_v8, %v539_v6 }
 0x214   : > { %685 = vst.msk [vmem:[%s1136_s4] sm:$0xff] %vm684_vm12, %v540_v0  ;;  %687 = vst.msk [vmem:[%s1136_s4 + $0x10] sm:$0xff] %vm684_vm12, %v541_v9  ;;  %v548_v19 = vcombine.low %v384_v63, %v390_v12  ;;  %v549_v21 = vcombine.high %v384_v63, %v390_v12  ;;  %v572_v28 = vrot.slane %v564_v20, %v1111_v32  ;;  %v399_v30 = vpop.permute.xlu1 %398 }
 0x215   : > { %689 = vst.msk [vmem:[%s1136_s4 + $0x20] sm:$0xff] %vm684_vm12, %v542_v10  ;;  %691 = vst.msk [vmem:[%s1136_s4 + $0x30] sm:$0xff] %vm684_vm12, %v543_v11  ;;  %v579_v35 = vrot.slane %v565_v24, %v1111_v32 }
 0x216   : > { %693 = vst.msk [vmem:[%s1136_s4 + $0x40] sm:$0xff] %vm684_vm12, %v544_v13  ;;  %695 = vst.msk [vmem:[%s1136_s4 + $0x50] sm:$0xff] %vm684_vm12, %v545_v14  ;;  %v556_v25 = vrot.slane %v548_v19, %v1111_v32  ;;  %v563_v29 = vrot.slane %v549_v21, %v1111_v32 }
 0x217   : > { %697 = vst.msk [vmem:[%s1136_s4 + $0x60] sm:$0xff] %vm684_vm12, %v546_v15  ;;  %699 = vst.msk [vmem:[%s1136_s4 + $0x70] sm:$0xff] %vm684_vm12, %v547_v16  ;;  %v396_v22 = vpop.permute.xlu0 %395 }
 0x218   : > { %v580_v26 = vcombine.low %v396_v22, %v407_v23  ;;  %v581_v27 = vcombine.high %v396_v22, %v407_v23  ;;  %v612_v36 = vcombine.low %v556_v25, %v572_v28  ;;  %v613_v37 = vcombine.high %v556_v25, %v572_v28 }
 0x219   : > { %v628_v41 = vcombine.low %v563_v29, %v579_v35  ;;  %v629_v42 = vcombine.high %v563_v29, %v579_v35 }
 0x21a   : > { %v588_v17 = vrot.slane %v580_v26, %v1111_v32  ;;  %v595_v38 = vrot.slane %v581_v27, %v1111_v32  ;;  %v620_v47 = vrot.slane %v612_v36, %v1119_v49  ;;  %v627_v48 = vrot.slane %v613_v37, %v1119_v49 }
 0x21b   : > { %v410_v31 = vpop.permute.xlu0 %409  ;;  %v636_v53 = vrot.slane %v628_v41, %v1119_v49  ;;  %v643_v54 = vrot.slane %v629_v42, %v1119_v49 }
 0x21c   : > { %v596_v33 = vcombine.low %v399_v30, %v410_v31  ;;  %v597_v34 = vcombine.high %v399_v30, %v410_v31 }
 0x21e   : > { %v604_v39 = vrot.slane %v596_v33, %v1111_v32  ;;  %v611_v40 = vrot.slane %v597_v34, %v1111_v32 }
 0x220   : > { %v644_v43 = vcombine.low %v588_v17, %v604_v39  ;;  %v645_v44 = vcombine.high %v588_v17, %v604_v39  ;;  %v660_v45 = vcombine.low %v595_v38, %v611_v40  ;;  %v661_v46 = vcombine.high %v595_v38, %v611_v40 }
 0x222   : > { %v652_v50 = vrot.slane %v644_v43, %v1119_v49  ;;  %v659_v51 = vrot.slane %v645_v44, %v1119_v49  ;;  %v668_v32 = vrot.slane %v660_v45, %v1119_v49  ;;  %v675_v52 = vrot.slane %v661_v46, %v1119_v49 }
 0x224   : > { %v676_v55 = vcombine.low %v620_v47, %v652_v50  ;;  %v677_v56 = vcombine.high %v620_v47, %v652_v50  ;;  %v678_v57 = vcombine.low %v627_v48, %v659_v51  ;;  %v679_v58 = vcombine.high %v627_v48, %v659_v51 }
 0x225   : > { %v680_v59 = vcombine.low %v636_v53, %v668_v32  ;;  %v681_v49 = vcombine.high %v636_v53, %v668_v32  ;;  %v682_v60 = vcombine.low %v643_v54, %v675_v52  ;;  %v683_v61 = vcombine.high %v643_v54, %v675_v52 }
 0x226   : > { %686 = vst.msk [vmem:[%s1136_s4 + $0x8] sm:$0xff] %vm684_vm12, %v676_v55  ;;  %688 = vst.msk [vmem:[%s1136_s4 + $0x18] sm:$0xff] %vm684_vm12, %v677_v56 }
 0x227   : > { %690 = vst.msk [vmem:[%s1136_s4 + $0x28] sm:$0xff] %vm684_vm12, %v678_v57  ;;  %692 = vst.msk [vmem:[%s1136_s4 + $0x38] sm:$0xff] %vm684_vm12, %v679_v58 }
 0x228   : > { %694 = vst.msk [vmem:[%s1136_s4 + $0x48] sm:$0xff] %vm684_vm12, %v680_v59  ;;  %696 = vst.msk [vmem:[%s1136_s4 + $0x58] sm:$0xff] %vm684_vm12, %v681_v49 }
 0x229   : > { %698 = vst.msk [vmem:[%s1136_s4 + $0x68] sm:$0xff] %vm684_vm12, %v682_v60  ;;  %700 = vst.msk [vmem:[%s1136_s4 + $0x78] sm:$0xff] %vm684_vm12, %v683_v61 }
 0x22a   : > { %933 = shalt.err (!%p930_p3)
}
 0x22b   : > { %s934_s23 = scalar_lea.hbm %s1176_s8, 2048  ;;  %s938_s26 = scalar_lea.hbm %s1241_s2, 4096 }
 0x22c   : > { %p935_p4 = scmp.ne.s32.totalorder %s1176_s8, %s934_s23  ;;  %p939_p9 = scmp.lt.u32.totalorder %s1176_s8, %s1241_s2 }
 0x22d   : > { %p940_p10 = scmp.lt.u32.totalorder %s938_s26, %s934_s23  ;;  %p942_p12 = scmp.lt.u32.totalorder %s934_s23, %s1176_s8 }
 0x22e   : > { %p936_p7 = pnand %p935_p4, %p1066_p5 }
 0x22f   : > { %p941_p11 = por %p940_p10, %p939_p9 }
 0x230   : > { %p937_p8 = pneg %p936_p7 }
 0x231   : > { %p943_p13 = por %p942_p12, %p941_p11 }
 0x233   : > { %p944_p0 = pnand %p943_p13, %p937_p8 }
 0x235   : > { %947 = shalt.err (!%p944_p0)
}
 0x236   : > { %s1011_s29 = smov 128   ;;  %s1012_s30 = smov 8  }
 0x237   : > { %813 = dma.vmem_to_hbm [thread:$0]  (%p1066_p5), %s1178_s6, 2048, %s1176_s8, %s1198_s14, %s1011_s29, %s1011_s29, %s1012_s30  }
 0x238 PF: > { %p819_p1 = scmp.ge.s32.totalorder %s982_s12, 2  ;;  %s730_s3 = sand.u32 1, %s970_s9  }
 0x239   : > { %s731_s4 = scalar_lea.sflag [#allocation3], %s730_s3 }
 0x23a   : > { %p816_p2 = pnand %p819_p1, %p1070_p6 }
 0x23c   : > { %965 = dma.done.wait (!%p816_p2), %s731_s4, 2048  }
 0x23d   : > { %967 = vsyncadd (!%p816_p2), %s731_s4, 4294965248  ;;  %p12_p3 = scmp.ge.s32.totalorder %s1053_s15, 4   ;;  %s1244_s9 = smov %s974_s10 }
 0x23e   : > { %s1245_s10 = smov %s978_s11  ;;  %s1246_s11 = smov %s1064_s18 }
 0x23f   : > { %s1247_s12 = smov %s1053_s15  ;;  %14 = sbr.rel (!%p12_p3) target bundleno = 3 (0x3), region = 63 }
 0x246   :  { %736 = vsyncpa [#allocation3], 1 }
 0x247   :  { %738 = vsyncpa [#allocation3 + $0x1], 1 }

</bundles_post_ra>
